<compile_context>
chip_gen: v7x
topology: tpu7x:2x2x1
jax: 0.10.0
libtpu: 0.0.40
codegen_flags: <defaults>
</compile_context>

<pallas_src>
import jax
import jax.numpy as jnp
from jax.experimental import pallas as pl
from jax.experimental.pallas import tpu as pltpu

INPUT_DIM = 32
OUTPUT_DIM = 8
H1 = 120
H2 = 100
H1_PAD = 128
H2_PAD = 128
OUT_PAD = 128
BN_EPS = 1e-5


def _round_up(n, m):
    return ((n + m - 1) // m) * m


def power_system_nn_kernel(x_ref, w1_ref, w2_ref, w3_ref, bias_ref, out_ref):
    # x_ref:    (TB, INPUT_DIM)      bf16
    # w1_ref:   (INPUT_DIM, H1_PAD)  bf16   (BN1 folded into columns, zero-padded)
    # w2_ref:   (H1_PAD, H2_PAD)     bf16   (BN2 folded, zero-padded)
    # w3_ref:   (H2_PAD, OUT_PAD)    bf16   (zero-padded rows and columns)
    # bias_ref: (3, 128)             f32    row0=b1', row1=b2', row2=b3 (lanes 0:8)
    # out_ref:  (TB, OUTPUT_DIM)     bf16
    x = x_ref[...]
    b1 = bias_ref[0:1, :]
    b2 = bias_ref[1:2, :]
    b3 = bias_ref[2:3, :]

    # fc1 (+ folded bn1) -> tanh (f32) -> materialize immediately as bf16.
    h1 = jnp.tanh(
        jnp.dot(x, w1_ref[...], preferred_element_type=jnp.float32) + b1
    ).astype(jnp.bfloat16)

    # Dropout(p=0.2) is identity in eval/inference mode.
    # TODO(synk): training-mode dropout (pltpu.prng_seed + prng_random_bits mask)
    # not implemented.

    # fc2 (+ folded bn2) -> tanh -> bf16.
    h2 = jnp.tanh(
        jnp.dot(h1, w2_ref[...], preferred_element_type=jnp.float32) + b2
    ).astype(jnp.bfloat16)

    # fc3 computed lane-dense at width 128, sliced to the 8 real outputs and
    # stored as bf16 (half the bytes of the previous f32 narrow store).
    y3 = jnp.dot(h2, w3_ref[...], preferred_element_type=jnp.float32) + b3
    out_ref[...] = y3[:, :OUTPUT_DIM].astype(out_ref.dtype)


def _resident_spec(shape):
    # Whole-array block, same block for every grid step -> stays VMEM-resident.
    return pl.BlockSpec(shape, lambda i: (0,) * len(shape))


def power_system_nn_forward(x, prepared, *, block_b=2048):
    """x: (B, INPUT_DIM) float; prepared: output of prepare_params(). Returns bf16."""
    w1, w2, w3, biases = prepared
    B = x.shape[0]

    # Batch tile: multiple of 16 (bf16 sublane packing), capped at block_b.
    TB = min(block_b, _round_up(B, 16))
    # Keep at least 2 grid steps when the batch allows so the "parallel" batch
    # axis can shard across v7x's two TensorCores (harmless on v5e/v6e).
    TB = min(TB, max(16, _round_up((B + 1) // 2, 16)))
    B_pad = _round_up(B, TB)

    xb = x.astype(jnp.bfloat16)
    if B_pad != B:
        xb = jnp.pad(xb, ((0, B_pad - B), (0, 0)))

    out = pl.pallas_call(
        power_system_nn_kernel,
        out_shape=jax.ShapeDtypeStruct((B_pad, OUTPUT_DIM), jnp.bfloat16),
        grid=(B_pad // TB,),
        in_specs=[
            pl.BlockSpec((TB, INPUT_DIM), lambda i: (i, 0)),
            _resident_spec(w1.shape),
            _resident_spec(w2.shape),
            _resident_spec(w3.shape),
            _resident_spec(biases.shape),
        ],
        out_specs=pl.BlockSpec((TB, OUTPUT_DIM), lambda i: (i, 0)),
        compiler_params=pltpu.CompilerParams(
            dimension_semantics=("parallel",),
            # v5e scoped-VMEM default is 16 MiB; larger batch tiles need more.
            vmem_limit_bytes=32 * 1024 * 1024,
        ),
    )(xb, w1, w2, w3, biases)
    return out[:B]


def make_params(key):
    """Deterministic synthetic parameters matching PowerSystemNN(__init__)."""
    ks = jax.random.split(key, 14)

    def linear(kw, kb, fan_in, fan_out):
        bound = 1.0 / jnp.sqrt(fan_in)
        # stored as (in, out): equivalent to PyTorch W (out, in) transposed.
        w = jax.random.uniform(kw, (fan_in, fan_out), jnp.float32, -bound, bound)
        b = jax.random.uniform(kb, (1, fan_out), jnp.float32, -bound, bound)
        return w, b

    w1, b1 = linear(ks[0], ks[1], INPUT_DIM, H1)
    w2, b2 = linear(ks[2], ks[3], H1, H2)
    w3, b3 = linear(ks[4], ks[5], H2, OUTPUT_DIM)

    def bn_fold(kg, kb2, km, kv, dim):
        gamma = 1.0 + 0.1 * jax.random.normal(kg, (1, dim), jnp.float32)
        beta = 0.1 * jax.random.normal(kb2, (1, dim), jnp.float32)
        running_mean = 0.1 * jax.random.normal(km, (1, dim), jnp.float32)
        running_var = 1.0 + 0.1 * jax.random.uniform(kv, (1, dim), jnp.float32)
        scale = gamma / jnp.sqrt(running_var + BN_EPS)
        shift = beta - running_mean * scale
        return scale, shift

    s1, t1 = bn_fold(ks[6], ks[7], ks[8], ks[9], H1)
    s2, t2 = bn_fold(ks[10], ks[11], ks[12], ks[13], H2)

    return (w1, b1, s1, t1, w2, b2, s2, t2, w3, b3)


def prepare_params(params):
    """Fold BN into Linear, zero-pad hidden dims to 128, cast weights to bf16."""
    (w1, b1, s1, t1, w2, b2, s2, t2, w3, b3) = params

    # BN folding:  (xW + b) * s + t  ==  x (W*s) + (b*s + t)
    w1f = w1 * s1
    b1f = b1 * s1 + t1
    w2f = w2 * s2
    b2f = b2 * s2 + t2

    # Zero padding keeps the math identical (padded lanes stay exactly 0).
    w1p = jnp.pad(w1f, ((0, 0), (0, H1_PAD - H1)))
    w2p = jnp.pad(w2f, ((0, H1_PAD - H1), (0, H2_PAD - H2)))
    w3p = jnp.pad(w3, ((0, H2_PAD - H2), (0, OUT_PAD - OUTPUT_DIM)))
    b1p = jnp.pad(b1f, ((0, 0), (0, H1_PAD - H1)))
    b2p = jnp.pad(b2f, ((0, 0), (0, H2_PAD - H2)))
    b3p = jnp.pad(b3, ((0, 0), (0, OUT_PAD - OUTPUT_DIM)))
    biases = jnp.concatenate([b1p, b2p, b3p], axis=0).astype(jnp.float32)  # (3,128)

    return (w1p.astype(jnp.bfloat16),
            w2p.astype(jnp.bfloat16),
            w3p.astype(jnp.bfloat16),
            biases)


def reference_forward_bf16(x, prepared):
    """Plain-JAX reference using the same bf16/padded operands as the kernel."""
    w1, w2, w3, biases = prepared
    b1 = biases[0:1, :]
    b2 = biases[1:2, :]
    b3 = biases[2:3, :]
    xb = x.astype(jnp.bfloat16)
    h1 = jnp.tanh(jnp.dot(xb, w1, preferred_element_type=jnp.float32) + b1)
    h2 = jnp.tanh(jnp.dot(h1.astype(jnp.bfloat16), w2,
                          preferred_element_type=jnp.float32) + b2)
    y3 = jnp.dot(h2.astype(jnp.bfloat16), w3,
                 preferred_element_type=jnp.float32) + b3
    return y3[:, :OUTPUT_DIM]


def reference_forward_f32(x, params):
    """Full-precision reference of the original module (eval mode)."""
    (w1, b1, s1, t1, w2, b2, s2, t2, w3, b3) = params
    h1 = jnp.tanh((x @ w1 + b1) * s1 + t1)
    h2 = jnp.tanh((h1 @ w2 + b2) * s2 + t2)
    return h2 @ w3 + b3


if __name__ == "__main__":
    key = jax.random.PRNGKey(0)
    k_in, k_par, k_in2 = jax.random.split(key, 3)

    params = make_params(k_par)
    prepared = prepare_params(params)

    # Small-shape check (single grid step, batch padded 8 -> 16).
    batch = 8
    x = jax.random.normal(k_in, (batch, INPUT_DIM), jnp.float32)
    out = jax.block_until_ready(power_system_nn_forward(x, prepared))
    assert out.shape == (batch, OUTPUT_DIM)
    assert out.dtype == jnp.bfloat16

    # Tight check against a reference using identical bf16 quantization
    # (extra slack for the final bf16 output cast).
    ref_bf16 = reference_forward_bf16(x, prepared)
    assert jnp.allclose(out.astype(jnp.float32), ref_bf16,
                        atol=3e-2, rtol=3e-2)

    # Loose sanity check against the full-f32 original semantics.
    ref_f32 = reference_forward_f32(x, params)
    assert jnp.allclose(out.astype(jnp.float32), ref_f32,
                        atol=1.5e-1, rtol=1.5e-1)

    # Multi-tile check: batch not a multiple of 16 -> padding + 2 grid steps
    # (exercises the v7x dual-TensorCore "parallel" split path).
    batch2 = 1000
    x2 = jax.random.normal(k_in2, (batch2, INPUT_DIM), jnp.float32)
    out2 = jax.block_until_ready(power_system_nn_forward(x2, prepared))
    assert out2.shape == (batch2, OUTPUT_DIM)
    ref2 = reference_forward_bf16(x2, prepared)
    assert jnp.allclose(out2.astype(jnp.float32), ref2, atol=3e-2, rtol=3e-2)

    print("KERNEL_OK")
</pallas_src>

<mosaic_0001>
module attributes {stable_mosaic.version = 11 : i64} {
  func.func @power_system_nn_kernel(%arg0: i32, %arg1: memref<16x32xbf16, #tpu.memory_space<vmem>>, %arg2: memref<32x128xbf16, #tpu.memory_space<vmem>>, %arg3: memref<128x128xbf16, #tpu.memory_space<vmem>>, %arg4: memref<128x128xbf16, #tpu.memory_space<vmem>>, %arg5: memref<3x128xf32, #tpu.memory_space<vmem>>, %arg6: memref<16x8xbf16, #tpu.memory_space<vmem>>) attributes {dimension_semantics = [#tpu.dimension_semantics<parallel>], iteration_bounds = array<i64: 1>, scalar_prefetch = 0 : i64, scratch_operands = 0 : i64, tpu.core_type = #tpu.core_type<tc>, window_params = [{transform_indices = @transform_0, window_bounds = array<i64: 16, 32>}, {pipeline_mode = #tpu.pipeline_mode<synchronous>, transform_indices = @transform_1, window_bounds = array<i64: 32, 128>}, {pipeline_mode = #tpu.pipeline_mode<synchronous>, transform_indices = @transform_2, window_bounds = array<i64: 128, 128>}, {pipeline_mode = #tpu.pipeline_mode<synchronous>, transform_indices = @transform_3, window_bounds = array<i64: 128, 128>}, {pipeline_mode = #tpu.pipeline_mode<synchronous>, transform_indices = @transform_4, window_bounds = array<i64: 3, 128>}, {transform_indices = @transform_5, window_bounds = array<i64: 16, 8>}]} {
    %c0 = arith.constant 0 : index
    %c0_0 = arith.constant 0 : index
    %0 = vector.load %arg1[%c0, %c0_0] : memref<16x32xbf16, #tpu.memory_space<vmem>>, vector<16x32xbf16>
    %c0_1 = arith.constant 0 : index
    %c0_2 = arith.constant 0 : index
    %1 = vector.load %arg5[%c0_1, %c0_2] : memref<3x128xf32, #tpu.memory_space<vmem>>, vector<1x128xf32>
    %c1 = arith.constant 1 : index
    %c0_3 = arith.constant 0 : index
    %2 = vector.load %arg5[%c1, %c0_3] : memref<3x128xf32, #tpu.memory_space<vmem>>, vector<1x128xf32>
    %c2 = arith.constant 2 : index
    %c0_4 = arith.constant 0 : index
    %3 = vector.load %arg5[%c2, %c0_4] : memref<3x128xf32, #tpu.memory_space<vmem>>, vector<1x128xf32>
    %c0_5 = arith.constant 0 : index
    %c0_6 = arith.constant 0 : index
    %4 = vector.load %arg2[%c0_5, %c0_6] : memref<32x128xbf16, #tpu.memory_space<vmem>>, vector<32x128xbf16>
    %cst = arith.constant dense<0.000000e+00> : vector<16x128xf32>
    %5 = tpu.matmul %0, %4, %cst {dimension_numbers = #tpu.dot_dimension_numbers<[1], [0], [0], [1], [0, 0, 1, 1], [], []>} : vector<16x32xbf16>, vector<32x128xbf16>, vector<16x128xf32> -> vector<16x128xf32>
    %6 = vector.broadcast %1 : vector<1x128xf32> to vector<16x128xf32>
    %7 = arith.addf %5, %6 : vector<16x128xf32>
    %8 = math.tanh %7 : vector<16x128xf32>
    %9 = arith.truncf %8 : vector<16x128xf32> to vector<16x128xbf16>
    %c0_7 = arith.constant 0 : index
    %c0_8 = arith.constant 0 : index
    %10 = vector.load %arg3[%c0_7, %c0_8] : memref<128x128xbf16, #tpu.memory_space<vmem>>, vector<128x128xbf16>
    %cst_9 = arith.constant dense<0.000000e+00> : vector<16x128xf32>
    %11 = tpu.matmul %9, %10, %cst_9 {dimension_numbers = #tpu.dot_dimension_numbers<[1], [0], [0], [1], [0, 0, 1, 1], [], []>} : vector<16x128xbf16>, vector<128x128xbf16>, vector<16x128xf32> -> vector<16x128xf32>
    %12 = vector.broadcast %2 : vector<1x128xf32> to vector<16x128xf32>
    %13 = arith.addf %11, %12 : vector<16x128xf32>
    %14 = math.tanh %13 : vector<16x128xf32>
    %15 = arith.truncf %14 : vector<16x128xf32> to vector<16x128xbf16>
    %c0_10 = arith.constant 0 : index
    %c0_11 = arith.constant 0 : index
    %16 = vector.load %arg4[%c0_10, %c0_11] : memref<128x128xbf16, #tpu.memory_space<vmem>>, vector<128x128xbf16>
    %cst_12 = arith.constant dense<0.000000e+00> : vector<16x128xf32>
    %17 = tpu.matmul %15, %16, %cst_12 {dimension_numbers = #tpu.dot_dimension_numbers<[1], [0], [0], [1], [0, 0, 1, 1], [], []>} : vector<16x128xbf16>, vector<128x128xbf16>, vector<16x128xf32> -> vector<16x128xf32>
    %18 = vector.broadcast %3 : vector<1x128xf32> to vector<16x128xf32>
    %19 = arith.addf %17, %18 : vector<16x128xf32>
    %20 = vector.extract_strided_slice %19 {offsets = [0, 0], sizes = [16, 8], strides = [1, 1]} : vector<16x128xf32> to vector<16x8xf32>
    %21 = arith.truncf %20 : vector<16x8xf32> to vector<16x8xbf16>
    %c0_13 = arith.constant 0 : index
    %c0_14 = arith.constant 0 : index
    %22 = vector.load %arg6[%c0_13, %c0_14] : memref<16x8xbf16, #tpu.memory_space<vmem>>, vector<16x8xbf16>
    tpu.vector_store %arg6[%c0_13, %c0_14], %21 {strides = array<i32>} : memref<16x8xbf16, #tpu.memory_space<vmem>>, vector<16x8xbf16>,
    return
  }
  func.func @transform_0(%arg0: i32) -> (i32, i32) {
    %c0_i32 = arith.constant 0 : i32
    %c0_i32_0 = arith.constant 0 : i32
    return %arg0, %c0_i32 : i32, i32
  }
  func.func @transform_1(%arg0: i32) -> (i32, i32) {
    %c0_i32 = arith.constant 0 : i32
    %c0_i32_0 = arith.constant 0 : i32
    %c0_i32_1 = arith.constant 0 : i32
    return %c0_i32, %c0_i32_0 : i32, i32
  }
  func.func @transform_2(%arg0: i32) -> (i32, i32) {
    %c0_i32 = arith.constant 0 : i32
    %c0_i32_0 = arith.constant 0 : i32
    %c0_i32_1 = arith.constant 0 : i32
    return %c0_i32, %c0_i32_0 : i32, i32
  }
  func.func @transform_3(%arg0: i32) -> (i32, i32) {
    %c0_i32 = arith.constant 0 : i32
    %c0_i32_0 = arith.constant 0 : i32
    %c0_i32_1 = arith.constant 0 : i32
    return %c0_i32, %c0_i32_0 : i32, i32
  }
  func.func @transform_4(%arg0: i32) -> (i32, i32) {
    %c0_i32 = arith.constant 0 : i32
    %c0_i32_0 = arith.constant 0 : i32
    %c0_i32_1 = arith.constant 0 : i32
    return %c0_i32, %c0_i32_0 : i32, i32
  }
  func.func @transform_5(%arg0: i32) -> (i32, i32) {
    %c0_i32 = arith.constant 0 : i32
    %c0_i32_0 = arith.constant 0 : i32
    return %arg0, %c0_i32 : i32, i32
  }
}

</mosaic_0001>

<bundles_post_ra>
// kernel: tpu_custom_call.1
= control target key start
LH: loop header
LB: loop body
LE: loop exit
PB: predicated region body
PF: predicated region fallthrough
CT: control target
= control target key end

     0   :  { %10 = vsyncpa [#allocation3], 0  ;;  %s769_s0 = inlined_call_operand.hbm [shape: bf16[16,32], index: 0, kind: input, shape index: {}]   ;;  %s770_s1 = inlined_call_operand.hbm [shape: bf16[32,128], index: 1, kind: input, shape index: {}]   ;;  %s771_s2 = inlined_call_operand.hbm [shape: bf16[128,128], index: 2, kind: input, shape index: {}]   ;;  %s772_s3 = inlined_call_operand.hbm [shape: bf16[128,128], index: 3, kind: input, shape index: {}]   ;;  %s773_s4 = inlined_call_operand.vmem [shape: f32[3,128], index: 4, kind: input, shape index: {}]   ;;  %s774_s5 = inlined_call_operand.vmem [shape: bf16[16,8], index: 5, kind: output, shape index: {}]  }
   0x1   :  { %11 = vsyncpa [#allocation5], 0 }
   0x2   :  { %12 = vsyncpa [#allocation8], 0  ;;  %s618_s18 = smov [#allocation4]   ;;  %s619_s20 = smov [#allocation2]  }
   0x3   :  { %s30_s19 = sshll.u32 %s618_s18, 4  ;;  %s18_s21 = sshll.u32 %s619_s20, 4  ;;  %s31_s19 = int_to_ptr.vmem [resolvable:$true] %s30_s19  ;;  %s656_s21 = int_to_ptr.vmem [resolvable:$true] %s18_s21 }
   0x4   :  { %s524_s24 = scalar_lea.hbm %s770_s1, 256 }
   0x5   :  { %p525_p0 = scmp.ne.s32.totalorder %s770_s1, %s524_s24  ;;  %p528_p1 = scmp.lt.u32.totalorder %s524_s24, %s770_s1 }
   0x7   :  { %p530_p2 = pnand %p528_p1, %p525_p0 }
   0x9   :  { %533 = shalt.err (!%p530_p2)
}
   0xa   :  { %s534_s29 = scalar_lea.vmem %s31_s19, 256  ;;  %p539_p4 = scmp.lt.s32.totalorder %s31_s19, %s31_s19 }
   0xb   :  { %p535_p3 = scmp.ne.s32.totalorder %s31_s19, %s534_s29  ;;  %p540_p5 = scmp.lt.s32.totalorder %s534_s29, %s534_s29 }
   0xd   :  { %p541_p6 = por %p540_p5, %p539_p4 }
   0xf   :  { %p542_p7 = pnand %p541_p6, %p535_p3 }
  0x11   :  { %545 = shalt.err (!%p542_p7)
}
  0x12   :  { %s620_s30 = smov 64   ;;  %s621_s6 = smov 4  }
  0x13   :  { %36 = dma.hbm_to_vmem [thread:$0]  %s770_s1, 256, %s31_s19, [#allocation5], %s620_s30, %s620_s30, %s621_s6  }
  0x14   :  { %s546_s11 = scalar_lea.hbm %s769_s0, 128 }
  0x15   :  { %p547_p8 = scmp.ne.s32.totalorder %s769_s0, %s546_s11  ;;  %p550_p9 = scmp.lt.u32.totalorder %s546_s11, %s769_s0 }
  0x17   :  { %p552_p10 = pnand %p550_p9, %p547_p8 }
  0x19   :  { %555 = shalt.err (!%p552_p10)
}
  0x1a   :  { %s556_s16 = scalar_lea.vmem %s656_s21, 128  ;;  %p561_p12 = scmp.lt.s32.totalorder %s656_s21, %s656_s21 }
  0x1b   :  { %p557_p11 = scmp.ne.s32.totalorder %s656_s21, %s556_s16  ;;  %p562_p13 = scmp.lt.s32.totalorder %s556_s16, %s556_s16 }
  0x1d   :  { %p563_p0 = por %p562_p13, %p561_p12 }
  0x1f   :  { %p564_p1 = pnand %p563_p0, %p557_p11 }
  0x21   :  { %567 = shalt.err (!%p564_p1)
}
  0x22   :  { %24 = dma.hbm_to_vmem [thread:$0]  %s769_s0, 128, %s656_s21, [#allocation3], %s620_s30, %s620_s30, %s621_s6  }
  0x23   :  { %s622_s18 = smov [#allocation6]   ;;  %s623_s20 = smov [#allocation7]  }
  0x24   :  { %s42_s19 = sshll.u32 %s622_s18, 4  ;;  %s54_s22 = sshll.u32 %s623_s20, 4  ;;  %s43_s19 = int_to_ptr.vmem [resolvable:$true] %s42_s19  ;;  %s693_s22 = int_to_ptr.vmem [resolvable:$true] %s54_s22 }
  0x25   :  { %s568_s25 = scalar_lea.hbm %s771_s2, 1024 }
  0x26   :  { %p569_p2 = scmp.ne.s32.totalorder %s771_s2, %s568_s25  ;;  %p572_p3 = scmp.lt.u32.totalorder %s568_s25, %s771_s2 }
  0x28   :  { %p574_p4 = pnand %p572_p3, %p569_p2 }
  0x2a   :  { %577 = shalt.err (!%p574_p4)
}
  0x2b   :  { %s578_s0 = scalar_lea.vmem %s43_s19, 1024  ;;  %p583_p6 = scmp.lt.s32.totalorder %s43_s19, %s43_s19 }
  0x2c   :  { %p579_p5 = scmp.ne.s32.totalorder %s43_s19, %s578_s0  ;;  %p584_p7 = scmp.lt.s32.totalorder %s578_s0, %s578_s0 }
  0x2e   :  { %p585_p8 = por %p584_p7, %p583_p6 }
  0x30   :  { %p586_p9 = pnand %p585_p8, %p579_p5 }
  0x32   :  { %589 = shalt.err (!%p586_p9)
}
  0x33   :  { %48 = dma.hbm_to_vmem [thread:$0]  %s771_s2, 1024, %s43_s19, [#allocation5], %s620_s30, %s620_s30, %s621_s6  }
  0x34   :  { %s590_s10 = scalar_lea.hbm %s772_s3, 1024 }
  0x35   :  { %p591_p10 = scmp.ne.s32.totalorder %s772_s3, %s590_s10  ;;  %p594_p11 = scmp.lt.u32.totalorder %s590_s10, %s772_s3 }
  0x37   :  { %p596_p12 = pnand %p594_p11, %p591_p10 }
  0x39   :  { %599 = shalt.err (!%p596_p12)
}
  0x3a   :  { %s600_s15 = scalar_lea.vmem %s693_s22, 1024  ;;  %p605_p0 = scmp.lt.s32.totalorder %s693_s22, %s693_s22 }
  0x3b   :  { %p601_p13 = scmp.ne.s32.totalorder %s693_s22, %s600_s15  ;;  %p606_p1 = scmp.lt.s32.totalorder %s600_s15, %s600_s15 }
  0x3d   :  { %p607_p2 = por %p606_p1, %p605_p0 }
  0x3f   :  { %p608_p3 = pnand %p607_p2, %p601_p13 }
  0x41   :  { %611 = shalt.err (!%p608_p3)
}
  0x42   :  { %60 = dma.hbm_to_vmem [thread:$0]  %s772_s3, 1024, %s693_s22, [#allocation8], %s620_s30, %s620_s30, %s621_s6  }
  0x43   :  { %612 = dma.done.wait [#allocation3], 128  }
  0x44   :  { %613 = vsyncadd [#allocation3], 4294967168 }
  0x45   :  { %614 = dma.done.wait [#allocation5], 1280  }
  0x46   :  { %615 = vsyncadd [#allocation5], 4294966016 }
  0x47   :  { %616 = dma.done.wait [#allocation8], 1024  }
  0x48   :  { %617 = vsyncadd [#allocation8], 4294966272  ;;  %v624_v0 = vmov 0.0   ;;  %vm625_vm0 = vmmov 0   ;;  %v497_v1 = vld [vmem:[#allocation4] sm:$0xff]   ;;  %v498_v2 = vld [vmem:[#allocation4 + $0x8] sm:$0xff]  }
  0x49   :  { %441 = vmatprep.subr.bf16.mxu0 %v624_v0  ;;  %445 = vmatprep.mubr.msk.bf16.mxu0 %vm625_vm0, %v624_v0  ;;  %v500_v3 = vld [vmem:[#allocation6] sm:$0xff]   ;;  %v499_v4 = vld [vmem:[#allocation2] sm:$0xff]   ;;  %vm106_vm1 = vcmask 261120   ;;  %v502_v6 = vld [vmem:[#allocation6 + $0x10] sm:$0xff]   ;;  %vm383_vm2 = vcmask 60416  }
  0x4a   :  { %449 = vmatprep.subr.bf16.mxu1 %v624_v0  ;;  %465 = vmatprep.mubr.msk.bf16.mxu1 %vm625_vm0, %v624_v0  ;;  %v501_v5 = vld [vmem:[#allocation6 + $0x8] sm:$0xff]   ;;  %v503_v7 = vld [vmem:[#allocation6 + $0x18] sm:$0xff]   ;;  %v504_v8 = vld [vmem:[#allocation6 + $0x20] sm:$0xff]  }
  0x4b   :  { %442 = vmatpush3.bf16.msra.mxu0 %v497_v1  ;;  %450 = vmatpush3.bf16.msra.mxu1 %v500_v3  ;;  %v505_v9 = vld [vmem:[#allocation6 + $0x28] sm:$0xff]   ;;  %v506_v10 = vld [vmem:[#allocation6 + $0x30] sm:$0xff]   ;;  %v507_v11 = vld [vmem:[#allocation6 + $0x38] sm:$0xff]  }
  0x4c   :  { %443 = vmatprep.subr.bf16.mxu0 %v624_v0  ;;  %451 = vmatprep.subr.bf16.mxu1 %v624_v0  ;;  %v508_v12 = vld [vmem:[#allocation7] sm:$0xff]   ;;  %v509_v13 = vld [vmem:[#allocation7 + $0x8] sm:$0xff]   ;;  %v510_v14 = vld [vmem:[#allocation7 + $0x10] sm:$0xff]  }
  0x4d   :  { %v511_v15 = vld [vmem:[#allocation7 + $0x18] sm:$0xff]   ;;  %v393_v16 = vld [vmem:[%s773_s4] ss:$0 sm:$0xff]  ;;  %v512_v26 = vld [vmem:[#allocation7 + $0x20] sm:$0xff]  }
  0x4e   :  { %v513_v27 = vld [vmem:[#allocation7 + $0x28] sm:$0xff]   ;;  %v514_v28 = vld [vmem:[#allocation7 + $0x30] sm:$0xff]   ;;  %v515_v29 = vld [vmem:[#allocation7 + $0x38] sm:$0xff]  }
  0x4f   :  { %444 = vmatpush3.bf16.msra.mxu0 %v498_v2  ;;  %452 = vmatpush3.bf16.msra.mxu1 %v501_v5  ;;  %v398_v30 = vld [vmem:[%s773_s4 + $0x1] ss:$0 sm:$0xff]  ;;  %v407_v40 = vld [vmem:[%s773_s4 + $0x2] ss:$0 sm:$0xff] }
  0x50   :  { %469 = vmatprep.subr.bf16.mxu0 %v624_v0  ;;  %453 = vmatprep.subr.bf16.mxu1 %v624_v0 }
  0x52   :  { %446 = vmatmul.mubr.msk.bf16.vlgmr.msra.gmra.mrb[0].mxu0 %vm106_vm1, %v499_v4 }
  0x53   :  { %485 = vmatprep.mubr.msk.bf16.mxu0 %vm625_vm0, %v624_v0  ;;  %454 = vmatpush3.bf16.msra.mxu1 %v502_v6 }
  0x54   :  { %455 = vmatprep.subr.bf16.mxu1 %v624_v0  ;;  %470 = vmatpush3.bf16.msra.mxu0 %v508_v12 }
  0x55   :  { %471 = vmatprep.subr.bf16.mxu0 %v624_v0 }
  0x57   :  { %456 = vmatpush3.bf16.msra.mxu1 %v503_v7 }
  0x58   :  { %457 = vmatprep.subr.bf16.mxu1 %v624_v0  ;;  %472 = vmatpush3.bf16.msra.mxu0 %v509_v13 }
  0x59   :  { %473 = vmatprep.subr.bf16.mxu0 %v624_v0 }
  0x5b   :  { %458 = vmatpush3.bf16.msra.mxu1 %v504_v8 }
  0x5c   :  { %459 = vmatprep.subr.bf16.mxu1 %v624_v0  ;;  %474 = vmatpush3.bf16.msra.mxu0 %v510_v14 }
  0x5d   :  { %475 = vmatprep.subr.bf16.mxu0 %v624_v0 }
  0x5f   :  { %460 = vmatpush3.bf16.msra.mxu1 %v505_v9 }
  0x60   :  { %461 = vmatprep.subr.bf16.mxu1 %v624_v0  ;;  %476 = vmatpush3.bf16.msra.mxu0 %v511_v15 }
  0x61   :  { %477 = vmatprep.subr.bf16.mxu0 %v624_v0 }
  0x63   :  { %462 = vmatpush3.bf16.msra.mxu1 %v506_v10 }
  0x64   :  { %463 = vmatprep.subr.bf16.mxu1 %v624_v0  ;;  %478 = vmatpush3.bf16.msra.mxu0 %v512_v26 }
  0x65   :  { %479 = vmatprep.subr.bf16.mxu0 %v624_v0 }
  0x67   :  { %464 = vmatpush3.bf16.msra.mxu1 %v507_v11 }
  0x68   :  { %480 = vmatpush3.bf16.msra.mxu0 %v513_v27 }
  0x69   :  { %481 = vmatprep.subr.bf16.mxu0 %v624_v0 }
  0x6c   :  { %482 = vmatpush3.bf16.msra.mxu0 %v514_v28 }
  0x6d   :  { %483 = vmatprep.subr.bf16.mxu0 %v624_v0 }
  0x70   :  { %484 = vmatpush3.bf16.msra.mxu0 %v515_v29 }
 0x125   :  { %v144_v17 = vpop.f32.mrb[0].mxu0 }
 0x126   :  { %v145_v18 = vadd.f32 %v393_v16, %v144_v17  ;;  %v447_v19 = vpop.f32.mrb[1].mxu0 }
 0x127   :  { %v147_v20 = vpop.f32.mrb[2].mxu0 }
 0x128   :  { %v148_v21 = vadd.f32 %v393_v16, %v147_v20  ;;  %v448_v22 = vpop.f32.mrb[3].mxu0  ;;  %516 = vtanh.f32 %v145_v18 }
 0x12a   :  { %518 = vtanh.f32 %v148_v21 }
 0x132   :  { %v517_v23 = vpop.eup %516 }
 0x134   :  { %v519_v24 = vpop.eup %518 }
 0x135   :  { %v153_v25 = vpack.c.bf16 %v519_v24, %v517_v23 }
 0x137   :  { %466 = vmatmul.mubr.bf16.vlgmr.msra.gmra.mrb[0].mxu1 %v153_v25 }
 0x20a   :  { %v256_v31 = vpop.f32.mrb[0].mxu1 }
 0x20b   :  { %v257_v32 = vadd.f32 %v398_v30, %v256_v31  ;;  %v467_v33 = vpop.f32.mrb[1].mxu1 }
 0x20c   :  { %v259_v34 = vpop.f32.mrb[2].mxu1 }
 0x20d   :  { %v260_v35 = vadd.f32 %v398_v30, %v259_v34  ;;  %v468_v36 = vpop.f32.mrb[3].mxu1  ;;  %520 = vtanh.f32 %v257_v32 }
 0x20f   :  { %522 = vtanh.f32 %v260_v35 }
 0x217   :  { %v521_v37 = vpop.eup %520 }
 0x219   :  { %v523_v38 = vpop.eup %522 }
 0x21a   :  { %v265_v39 = vpack.c.bf16 %v523_v38, %v521_v37 }
 0x21c   :  { %486 = vmatmul.mubr.bf16.vlgmr.msra.gmra.mrb[4].mxu0 %v265_v39 }
 0x2ef   :  { %v368_v41 = vpop.f32.mrb[4].mxu0 }
 0x2f0   :  { %v369_v42 = vadd.f32 %v407_v40, %v368_v41  ;;  %v487_v43 = vpop.f32.mrb[5].mxu0 }
 0x2f1   :  { %v371_v44 = vpop.f32.mrb[6].mxu0 }
 0x2f2   :  { %v418_v45 = vpack.c.bf16 %v369_v42, %v369_v42  ;;  %v372_v46 = vadd.f32 %v407_v40, %v371_v44  ;;  %v488_v47 = vpop.f32.mrb[7].mxu0 }
 0x2f4   :  { %384 = vst.msk [vmem:[%s774_s5] sm:$0xf] %vm383_vm2, %v418_v45  ;;  %v419_v48 = vpack.c.bf16 %v372_v46, %v372_v46 }
 0x2f6   :  { %385 = vst.msk [vmem:[%s774_s5 + $0x4] sm:$0xf] %vm383_vm2, %v419_v48 }
 0x2f7   :  { %390 = vsyncpa [#allocation3], 1 }
 0x2f8   :  { %391 = vsyncpa [#allocation5], 1 }
 0x2f9   :  { %392 = vsyncpa [#allocation8], 1 }

</bundles_post_ra>
